<compile_context>
chip_gen: v7x
topology: tpu7x:2x2x1
jax: 0.10.0
libtpu: 0.0.40
codegen_flags: <defaults>
</compile_context>

<pallas_src>
import functools

import jax
import jax.numpy as jnp
from jax.experimental import pallas as pl
from jax.experimental.pallas import tpu as pltpu


def _patch_creator_kernel(x_ref, o_ref, *, C, P):
    """One grid step = one batch element x `block_rows` rows of patches.

    x_ref: (1, C, hb, P, Wp, P)  block of x.reshape(N, C, Hp, P, Wp, P)
    o_ref: (1, hb, Wp, K)        block of the (N, Hp, Wp, K) output, K = C*P*P

    Pure data movement: each (c, ph) pair owns a contiguous group of P output
    lanes; copy it for all hb patch rows and all Wp patch columns in one go.
    C*P statically-unrolled statements (small: C*P is 16..64 in practice).
    """
    for c in range(C):
        for ph in range(P):
            k0 = (c * P + ph) * P
            o_ref[0, :, :, k0:k0 + P] = x_ref[0, c, :, ph, :, :]


def _round_up(x, m):
    return -(-x // m) * m


def _pick_block_rows(Hp, Wp, C, P, K, itemsize, vmem_budget=8 * 1024 * 1024):
    """Largest divisor of Hp whose double-buffered, lane-padded blocks fit."""
    sub = _round_up(Wp, 8)
    in_per_row = C * P * sub * _round_up(P, 128) * itemsize    # (Wp, P) tiles
    out_per_row = sub * _round_up(K, 128) * itemsize           # (Wp, K) tile
    per_row = 2 * (in_per_row + out_per_row)                   # double-buffered
    best = 1
    for hb in range(1, Hp + 1):
        if Hp % hb == 0 and hb * per_row <= vmem_budget:
            best = hb
    return best


def patch_creator(x, patch_size, *, block_rows=None):
    """Equivalent of PatchCreator.forward(x) for NCHW input x."""
    N, C, H, W = x.shape
    P = patch_size
    assert H % P == 0 and W % P == 0, "spatial dims must be divisible by patch_size"
    Hp, Wp = H // P, W // P
    L, K = Hp * Wp, C * P * P

    if block_rows is None:
        block_rows = _pick_block_rows(Hp, Wp, C, P, K, x.dtype.itemsize)
    assert Hp % block_rows == 0, "block_rows must divide H // patch_size"
    hb = block_rows
    R = Hp // hb

    # Free (metadata-only) reshape: split H -> (Hp, P) and W -> (Wp, P).  The
    # per-step HBM reads stay W-contiguous; the (Wp, P) tiles land in VMEM.
    x6 = x.reshape(N, C, Hp, P, Wp, P)

    kernel = functools.partial(_patch_creator_kernel, C=C, P=P)
    bytes_accessed = 2 * x.size * x.dtype.itemsize  # read once + write once

    out4 = pl.pallas_call(
        kernel,
        out_shape=jax.ShapeDtypeStruct((N, Hp, Wp, K), x.dtype),
        grid_spec=pltpu.PrefetchScalarGridSpec(
            num_scalar_prefetch=0,
            grid=(N, R),
            in_specs=[pl.BlockSpec((1, C, hb, P, Wp, P),
                                   lambda n, r: (n, 0, r, 0, 0, 0))],
            out_specs=pl.BlockSpec((1, hb, Wp, K),
                                   lambda n, r: (n, r, 0, 0)),
        ),
        compiler_params=pltpu.CompilerParams(
            dimension_semantics=("parallel", "parallel")),
        cost_estimate=pl.CostEstimate(flops=0, transcendentals=0,
                                      bytes_accessed=bytes_accessed),
    )(x6)

    # Free reshape back to the PyTorch unfold(...).transpose(1, 2) layout.
    return out4.reshape(N, L, K)


def _reference_unfold_transpose(x, patch_size):
    """Pure-JAX reference: nn.Unfold(P, stride=P)(x).transpose(1, 2)."""
    N, C, H, W = x.shape
    P = patch_size
    Hp, Wp = H // P, W // P
    y = x.reshape(N, C, Hp, P, Wp, P)
    y = jnp.transpose(y, (0, 2, 4, 1, 3, 5))   # (N, Hp, Wp, C, P, P)
    return y.reshape(N, Hp * Wp, C * P * P)


if __name__ == "__main__":
    # config = {'patch_size': 4}; PatchCreator has no learnable parameters.
    patch_size = 4
    N, C, H, W = 2, 4, 16, 16

    key = jax.random.PRNGKey(0)
    x = jax.random.normal(key, (N, C, H, W), dtype=jnp.float32)

    out = jax.block_until_ready(patch_creator(x, patch_size))

    ref = _reference_unfold_transpose(x, patch_size)
    assert out.shape == (N, (H // patch_size) * (W // patch_size),
                         C * patch_size * patch_size)
    assert jnp.allclose(out, ref), "Pallas output mismatch vs reference unfold"

    print("KERNEL_OK")
</pallas_src>

<mosaic_0001>
module attributes {stable_mosaic.version = 11 : i64} {
  func.func @_patch_creator_kernel(%arg0: i32, %arg1: i32, %arg2: memref<1x4x4x4x4x4xf32, #tpu.memory_space<vmem>>, %arg3: memref<1x4x4x64xf32, #tpu.memory_space<vmem>>) attributes {dimension_semantics = [#tpu.dimension_semantics<parallel>, #tpu.dimension_semantics<parallel>], iteration_bounds = array<i64: 2, 1>, scalar_prefetch = 0 : i64, scratch_operands = 0 : i64, tpu.core_type = #tpu.core_type<tc>, window_params = [{transform_indices = @transform_0, window_bounds = array<i64: 1, 4, 4, 4, 4, 4>}, {transform_indices = @transform_1, window_bounds = array<i64: 1, 4, 4, 64>}]} {
    %c0 = arith.constant 0 : index
    %c0_0 = arith.constant 0 : index
    %c0_1 = arith.constant 0 : index
    %c0_2 = arith.constant 0 : index
    %c0_3 = arith.constant 0 : index
    %c0_4 = arith.constant 0 : index
    %0 = vector.load %arg2[%c0, %c0_0, %c0_1, %c0_2, %c0_3, %c0_4] : memref<1x4x4x4x4x4xf32, #tpu.memory_space<vmem>>, vector<1x1x4x1x4x4xf32>
    %1 = vector.shape_cast %0 : vector<1x1x4x1x4x4xf32> to vector<4x4x4xf32>
    %c0_5 = arith.constant 0 : index
    %c0_6 = arith.constant 0 : index
    %c0_7 = arith.constant 0 : index
    %c0_8 = arith.constant 0 : index
    %2 = vector.load %arg3[%c0_5, %c0_6, %c0_7, %c0_8] : memref<1x4x4x64xf32, #tpu.memory_space<vmem>>, vector<1x4x4x4xf32>
    %3 = vector.shape_cast %2 : vector<1x4x4x4xf32> to vector<4x4x4xf32>
    %4 = vector.shape_cast %1 : vector<4x4x4xf32> to vector<1x4x4x4xf32>
    tpu.vector_store %arg3[%c0_5, %c0_6, %c0_7, %c0_8], %4 {strides = array<i32>} : memref<1x4x4x64xf32, #tpu.memory_space<vmem>>, vector<1x4x4x4xf32>,
    %c0_9 = arith.constant 0 : index
    %c0_10 = arith.constant 0 : index
    %c0_11 = arith.constant 0 : index
    %c1 = arith.constant 1 : index
    %c0_12 = arith.constant 0 : index
    %c0_13 = arith.constant 0 : index
    %5 = vector.load %arg2[%c0_9, %c0_10, %c0_11, %c1, %c0_12, %c0_13] : memref<1x4x4x4x4x4xf32, #tpu.memory_space<vmem>>, vector<1x1x4x1x4x4xf32>
    %6 = vector.shape_cast %5 : vector<1x1x4x1x4x4xf32> to vector<4x4x4xf32>
    %c0_14 = arith.constant 0 : index
    %c0_15 = arith.constant 0 : index
    %c0_16 = arith.constant 0 : index
    %c4 = arith.constant 4 : index
    %7 = vector.load %arg3[%c0_14, %c0_15, %c0_16, %c4] : memref<1x4x4x64xf32, #tpu.memory_space<vmem>>, vector<1x4x4x4xf32>
    %8 = vector.shape_cast %7 : vector<1x4x4x4xf32> to vector<4x4x4xf32>
    %9 = vector.shape_cast %6 : vector<4x4x4xf32> to vector<1x4x4x4xf32>
    tpu.vector_store %arg3[%c0_14, %c0_15, %c0_16, %c4], %9 {strides = array<i32>} : memref<1x4x4x64xf32, #tpu.memory_space<vmem>>, vector<1x4x4x4xf32>,
    %c0_17 = arith.constant 0 : index
    %c0_18 = arith.constant 0 : index
    %c0_19 = arith.constant 0 : index
    %c2 = arith.constant 2 : index
    %c0_20 = arith.constant 0 : index
    %c0_21 = arith.constant 0 : index
    %10 = vector.load %arg2[%c0_17, %c0_18, %c0_19, %c2, %c0_20, %c0_21] : memref<1x4x4x4x4x4xf32, #tpu.memory_space<vmem>>, vector<1x1x4x1x4x4xf32>
    %11 = vector.shape_cast %10 : vector<1x1x4x1x4x4xf32> to vector<4x4x4xf32>
    %c0_22 = arith.constant 0 : index
    %c0_23 = arith.constant 0 : index
    %c0_24 = arith.constant 0 : index
    %c8 = arith.constant 8 : index
    %12 = vector.load %arg3[%c0_22, %c0_23, %c0_24, %c8] : memref<1x4x4x64xf32, #tpu.memory_space<vmem>>, vector<1x4x4x4xf32>
    %13 = vector.shape_cast %12 : vector<1x4x4x4xf32> to vector<4x4x4xf32>
    %14 = vector.shape_cast %11 : vector<4x4x4xf32> to vector<1x4x4x4xf32>
    tpu.vector_store %arg3[%c0_22, %c0_23, %c0_24, %c8], %14 {strides = array<i32>} : memref<1x4x4x64xf32, #tpu.memory_space<vmem>>, vector<1x4x4x4xf32>,
    %c0_25 = arith.constant 0 : index
    %c0_26 = arith.constant 0 : index
    %c0_27 = arith.constant 0 : index
    %c3 = arith.constant 3 : index
    %c0_28 = arith.constant 0 : index
    %c0_29 = arith.constant 0 : index
    %15 = vector.load %arg2[%c0_25, %c0_26, %c0_27, %c3, %c0_28, %c0_29] : memref<1x4x4x4x4x4xf32, #tpu.memory_space<vmem>>, vector<1x1x4x1x4x4xf32>
    %16 = vector.shape_cast %15 : vector<1x1x4x1x4x4xf32> to vector<4x4x4xf32>
    %c0_30 = arith.constant 0 : index
    %c0_31 = arith.constant 0 : index
    %c0_32 = arith.constant 0 : index
    %c12 = arith.constant 12 : index
    %17 = vector.load %arg3[%c0_30, %c0_31, %c0_32, %c12] : memref<1x4x4x64xf32, #tpu.memory_space<vmem>>, vector<1x4x4x4xf32>
    %18 = vector.shape_cast %17 : vector<1x4x4x4xf32> to vector<4x4x4xf32>
    %19 = vector.shape_cast %16 : vector<4x4x4xf32> to vector<1x4x4x4xf32>
    tpu.vector_store %arg3[%c0_30, %c0_31, %c0_32, %c12], %19 {strides = array<i32>} : memref<1x4x4x64xf32, #tpu.memory_space<vmem>>, vector<1x4x4x4xf32>,
    %c0_33 = arith.constant 0 : index
    %c1_34 = arith.constant 1 : index
    %c0_35 = arith.constant 0 : index
    %c0_36 = arith.constant 0 : index
    %c0_37 = arith.constant 0 : index
    %c0_38 = arith.constant 0 : index
    %20 = vector.load %arg2[%c0_33, %c1_34, %c0_35, %c0_36, %c0_37, %c0_38] : memref<1x4x4x4x4x4xf32, #tpu.memory_space<vmem>>, vector<1x1x4x1x4x4xf32>
    %21 = vector.shape_cast %20 : vector<1x1x4x1x4x4xf32> to vector<4x4x4xf32>
    %c0_39 = arith.constant 0 : index
    %c0_40 = arith.constant 0 : index
    %c0_41 = arith.constant 0 : index
    %c16 = arith.constant 16 : index
    %22 = vector.load %arg3[%c0_39, %c0_40, %c0_41, %c16] : memref<1x4x4x64xf32, #tpu.memory_space<vmem>>, vector<1x4x4x4xf32>
    %23 = vector.shape_cast %22 : vector<1x4x4x4xf32> to vector<4x4x4xf32>
    %24 = vector.shape_cast %21 : vector<4x4x4xf32> to vector<1x4x4x4xf32>
    tpu.vector_store %arg3[%c0_39, %c0_40, %c0_41, %c16], %24 {strides = array<i32>} : memref<1x4x4x64xf32, #tpu.memory_space<vmem>>, vector<1x4x4x4xf32>,
    %c0_42 = arith.constant 0 : index
    %c1_43 = arith.constant 1 : index
    %c0_44 = arith.constant 0 : index
    %c1_45 = arith.constant 1 : index
    %c0_46 = arith.constant 0 : index
    %c0_47 = arith.constant 0 : index
    %25 = vector.load %arg2[%c0_42, %c1_43, %c0_44, %c1_45, %c0_46, %c0_47] : memref<1x4x4x4x4x4xf32, #tpu.memory_space<vmem>>, vector<1x1x4x1x4x4xf32>
    %26 = vector.shape_cast %25 : vector<1x1x4x1x4x4xf32> to vector<4x4x4xf32>
    %c0_48 = arith.constant 0 : index
    %c0_49 = arith.constant 0 : index
    %c0_50 = arith.constant 0 : index
    %c20 = arith.constant 20 : index
    %27 = vector.load %arg3[%c0_48, %c0_49, %c0_50, %c20] : memref<1x4x4x64xf32, #tpu.memory_space<vmem>>, vector<1x4x4x4xf32>
    %28 = vector.shape_cast %27 : vector<1x4x4x4xf32> to vector<4x4x4xf32>
    %29 = vector.shape_cast %26 : vector<4x4x4xf32> to vector<1x4x4x4xf32>
    tpu.vector_store %arg3[%c0_48, %c0_49, %c0_50, %c20], %29 {strides = array<i32>} : memref<1x4x4x64xf32, #tpu.memory_space<vmem>>, vector<1x4x4x4xf32>,
    %c0_51 = arith.constant 0 : index
    %c1_52 = arith.constant 1 : index
    %c0_53 = arith.constant 0 : index
    %c2_54 = arith.constant 2 : index
    %c0_55 = arith.constant 0 : index
    %c0_56 = arith.constant 0 : index
    %30 = vector.load %arg2[%c0_51, %c1_52, %c0_53, %c2_54, %c0_55, %c0_56] : memref<1x4x4x4x4x4xf32, #tpu.memory_space<vmem>>, vector<1x1x4x1x4x4xf32>
    %31 = vector.shape_cast %30 : vector<1x1x4x1x4x4xf32> to vector<4x4x4xf32>
    %c0_57 = arith.constant 0 : index
    %c0_58 = arith.constant 0 : index
    %c0_59 = arith.constant 0 : index
    %c24 = arith.constant 24 : index
    %32 = vector.load %arg3[%c0_57, %c0_58, %c0_59, %c24] : memref<1x4x4x64xf32, #tpu.memory_space<vmem>>, vector<1x4x4x4xf32>
    %33 = vector.shape_cast %32 : vector<1x4x4x4xf32> to vector<4x4x4xf32>
    %34 = vector.shape_cast %31 : vector<4x4x4xf32> to vector<1x4x4x4xf32>
    tpu.vector_store %arg3[%c0_57, %c0_58, %c0_59, %c24], %34 {strides = array<i32>} : memref<1x4x4x64xf32, #tpu.memory_space<vmem>>, vector<1x4x4x4xf32>,
    %c0_60 = arith.constant 0 : index
    %c1_61 = arith.constant 1 : index
    %c0_62 = arith.constant 0 : index
    %c3_63 = arith.constant 3 : index
    %c0_64 = arith.constant 0 : index
    %c0_65 = arith.constant 0 : index
    %35 = vector.load %arg2[%c0_60, %c1_61, %c0_62, %c3_63, %c0_64, %c0_65] : memref<1x4x4x4x4x4xf32, #tpu.memory_space<vmem>>, vector<1x1x4x1x4x4xf32>
    %36 = vector.shape_cast %35 : vector<1x1x4x1x4x4xf32> to vector<4x4x4xf32>
    %c0_66 = arith.constant 0 : index
    %c0_67 = arith.constant 0 : index
    %c0_68 = arith.constant 0 : index
    %c28 = arith.constant 28 : index
    %37 = vector.load %arg3[%c0_66, %c0_67, %c0_68, %c28] : memref<1x4x4x64xf32, #tpu.memory_space<vmem>>, vector<1x4x4x4xf32>
    %38 = vector.shape_cast %37 : vector<1x4x4x4xf32> to vector<4x4x4xf32>
    %39 = vector.shape_cast %36 : vector<4x4x4xf32> to vector<1x4x4x4xf32>
    tpu.vector_store %arg3[%c0_66, %c0_67, %c0_68, %c28], %39 {strides = array<i32>} : memref<1x4x4x64xf32, #tpu.memory_space<vmem>>, vector<1x4x4x4xf32>,
    %c0_69 = arith.constant 0 : index
    %c2_70 = arith.constant 2 : index
    %c0_71 = arith.constant 0 : index
    %c0_72 = arith.constant 0 : index
    %c0_73 = arith.constant 0 : index
    %c0_74 = arith.constant 0 : index
    %40 = vector.load %arg2[%c0_69, %c2_70, %c0_71, %c0_72, %c0_73, %c0_74] : memref<1x4x4x4x4x4xf32, #tpu.memory_space<vmem>>, vector<1x1x4x1x4x4xf32>
    %41 = vector.shape_cast %40 : vector<1x1x4x1x4x4xf32> to vector<4x4x4xf32>
    %c0_75 = arith.constant 0 : index
    %c0_76 = arith.constant 0 : index
    %c0_77 = arith.constant 0 : index
    %c32 = arith.constant 32 : index
    %42 = vector.load %arg3[%c0_75, %c0_76, %c0_77, %c32] : memref<1x4x4x64xf32, #tpu.memory_space<vmem>>, vector<1x4x4x4xf32>
    %43 = vector.shape_cast %42 : vector<1x4x4x4xf32> to vector<4x4x4xf32>
    %44 = vector.shape_cast %41 : vector<4x4x4xf32> to vector<1x4x4x4xf32>
    tpu.vector_store %arg3[%c0_75, %c0_76, %c0_77, %c32], %44 {strides = array<i32>} : memref<1x4x4x64xf32, #tpu.memory_space<vmem>>, vector<1x4x4x4xf32>,
    %c0_78 = arith.constant 0 : index
    %c2_79 = arith.constant 2 : index
    %c0_80 = arith.constant 0 : index
    %c1_81 = arith.constant 1 : index
    %c0_82 = arith.constant 0 : index
    %c0_83 = arith.constant 0 : index
    %45 = vector.load %arg2[%c0_78, %c2_79, %c0_80, %c1_81, %c0_82, %c0_83] : memref<1x4x4x4x4x4xf32, #tpu.memory_space<vmem>>, vector<1x1x4x1x4x4xf32>
    %46 = vector.shape_cast %45 : vector<1x1x4x1x4x4xf32> to vector<4x4x4xf32>
    %c0_84 = arith.constant 0 : index
    %c0_85 = arith.constant 0 : index
    %c0_86 = arith.constant 0 : index
    %c36 = arith.constant 36 : index
    %47 = vector.load %arg3[%c0_84, %c0_85, %c0_86, %c36] : memref<1x4x4x64xf32, #tpu.memory_space<vmem>>, vector<1x4x4x4xf32>
    %48 = vector.shape_cast %47 : vector<1x4x4x4xf32> to vector<4x4x4xf32>
    %49 = vector.shape_cast %46 : vector<4x4x4xf32> to vector<1x4x4x4xf32>
    tpu.vector_store %arg3[%c0_84, %c0_85, %c0_86, %c36], %49 {strides = array<i32>} : memref<1x4x4x64xf32, #tpu.memory_space<vmem>>, vector<1x4x4x4xf32>,
    %c0_87 = arith.constant 0 : index
    %c2_88 = arith.constant 2 : index
    %c0_89 = arith.constant 0 : index
    %c2_90 = arith.constant 2 : index
    %c0_91 = arith.constant 0 : index
    %c0_92 = arith.constant 0 : index
    %50 = vector.load %arg2[%c0_87, %c2_88, %c0_89, %c2_90, %c0_91, %c0_92] : memref<1x4x4x4x4x4xf32, #tpu.memory_space<vmem>>, vector<1x1x4x1x4x4xf32>
    %51 = vector.shape_cast %50 : vector<1x1x4x1x4x4xf32> to vector<4x4x4xf32>
    %c0_93 = arith.constant 0 : index
    %c0_94 = arith.constant 0 : index
    %c0_95 = arith.constant 0 : index
    %c40 = arith.constant 40 : index
    %52 = vector.load %arg3[%c0_93, %c0_94, %c0_95, %c40] : memref<1x4x4x64xf32, #tpu.memory_space<vmem>>, vector<1x4x4x4xf32>
    %53 = vector.shape_cast %52 : vector<1x4x4x4xf32> to vector<4x4x4xf32>
    %54 = vector.shape_cast %51 : vector<4x4x4xf32> to vector<1x4x4x4xf32>
    tpu.vector_store %arg3[%c0_93, %c0_94, %c0_95, %c40], %54 {strides = array<i32>} : memref<1x4x4x64xf32, #tpu.memory_space<vmem>>, vector<1x4x4x4xf32>,
    %c0_96 = arith.constant 0 : index
    %c2_97 = arith.constant 2 : index
    %c0_98 = arith.constant 0 : index
    %c3_99 = arith.constant 3 : index
    %c0_100 = arith.constant 0 : index
    %c0_101 = arith.constant 0 : index
    %55 = vector.load %arg2[%c0_96, %c2_97, %c0_98, %c3_99, %c0_100, %c0_101] : memref<1x4x4x4x4x4xf32, #tpu.memory_space<vmem>>, vector<1x1x4x1x4x4xf32>
    %56 = vector.shape_cast %55 : vector<1x1x4x1x4x4xf32> to vector<4x4x4xf32>
    %c0_102 = arith.constant 0 : index
    %c0_103 = arith.constant 0 : index
    %c0_104 = arith.constant 0 : index
    %c44 = arith.constant 44 : index
    %57 = vector.load %arg3[%c0_102, %c0_103, %c0_104, %c44] : memref<1x4x4x64xf32, #tpu.memory_space<vmem>>, vector<1x4x4x4xf32>
    %58 = vector.shape_cast %57 : vector<1x4x4x4xf32> to vector<4x4x4xf32>
    %59 = vector.shape_cast %56 : vector<4x4x4xf32> to vector<1x4x4x4xf32>
    tpu.vector_store %arg3[%c0_102, %c0_103, %c0_104, %c44], %59 {strides = array<i32>} : memref<1x4x4x64xf32, #tpu.memory_space<vmem>>, vector<1x4x4x4xf32>,
    %c0_105 = arith.constant 0 : index
    %c3_106 = arith.constant 3 : index
    %c0_107 = arith.constant 0 : index
    %c0_108 = arith.constant 0 : index
    %c0_109 = arith.constant 0 : index
    %c0_110 = arith.constant 0 : index
    %60 = vector.load %arg2[%c0_105, %c3_106, %c0_107, %c0_108, %c0_109, %c0_110] : memref<1x4x4x4x4x4xf32, #tpu.memory_space<vmem>>, vector<1x1x4x1x4x4xf32>
    %61 = vector.shape_cast %60 : vector<1x1x4x1x4x4xf32> to vector<4x4x4xf32>
    %c0_111 = arith.constant 0 : index
    %c0_112 = arith.constant 0 : index
    %c0_113 = arith.constant 0 : index
    %c48 = arith.constant 48 : index
    %62 = vector.load %arg3[%c0_111, %c0_112, %c0_113, %c48] : memref<1x4x4x64xf32, #tpu.memory_space<vmem>>, vector<1x4x4x4xf32>
    %63 = vector.shape_cast %62 : vector<1x4x4x4xf32> to vector<4x4x4xf32>
    %64 = vector.shape_cast %61 : vector<4x4x4xf32> to vector<1x4x4x4xf32>
    tpu.vector_store %arg3[%c0_111, %c0_112, %c0_113, %c48], %64 {strides = array<i32>} : memref<1x4x4x64xf32, #tpu.memory_space<vmem>>, vector<1x4x4x4xf32>,
    %c0_114 = arith.constant 0 : index
    %c3_115 = arith.constant 3 : index
    %c0_116 = arith.constant 0 : index
    %c1_117 = arith.constant 1 : index
    %c0_118 = arith.constant 0 : index
    %c0_119 = arith.constant 0 : index
    %65 = vector.load %arg2[%c0_114, %c3_115, %c0_116, %c1_117, %c0_118, %c0_119] : memref<1x4x4x4x4x4xf32, #tpu.memory_space<vmem>>, vector<1x1x4x1x4x4xf32>
    %66 = vector.shape_cast %65 : vector<1x1x4x1x4x4xf32> to vector<4x4x4xf32>
    %c0_120 = arith.constant 0 : index
    %c0_121 = arith.constant 0 : index
    %c0_122 = arith.constant 0 : index
    %c52 = arith.constant 52 : index
    %67 = vector.load %arg3[%c0_120, %c0_121, %c0_122, %c52] : memref<1x4x4x64xf32, #tpu.memory_space<vmem>>, vector<1x4x4x4xf32>
    %68 = vector.shape_cast %67 : vector<1x4x4x4xf32> to vector<4x4x4xf32>
    %69 = vector.shape_cast %66 : vector<4x4x4xf32> to vector<1x4x4x4xf32>
    tpu.vector_store %arg3[%c0_120, %c0_121, %c0_122, %c52], %69 {strides = array<i32>} : memref<1x4x4x64xf32, #tpu.memory_space<vmem>>, vector<1x4x4x4xf32>,
    %c0_123 = arith.constant 0 : index
    %c3_124 = arith.constant 3 : index
    %c0_125 = arith.constant 0 : index
    %c2_126 = arith.constant 2 : index
    %c0_127 = arith.constant 0 : index
    %c0_128 = arith.constant 0 : index
    %70 = vector.load %arg2[%c0_123, %c3_124, %c0_125, %c2_126, %c0_127, %c0_128] : memref<1x4x4x4x4x4xf32, #tpu.memory_space<vmem>>, vector<1x1x4x1x4x4xf32>
    %71 = vector.shape_cast %70 : vector<1x1x4x1x4x4xf32> to vector<4x4x4xf32>
    %c0_129 = arith.constant 0 : index
    %c0_130 = arith.constant 0 : index
    %c0_131 = arith.constant 0 : index
    %c56 = arith.constant 56 : index
    %72 = vector.load %arg3[%c0_129, %c0_130, %c0_131, %c56] : memref<1x4x4x64xf32, #tpu.memory_space<vmem>>, vector<1x4x4x4xf32>
    %73 = vector.shape_cast %72 : vector<1x4x4x4xf32> to vector<4x4x4xf32>
    %74 = vector.shape_cast %71 : vector<4x4x4xf32> to vector<1x4x4x4xf32>
    tpu.vector_store %arg3[%c0_129, %c0_130, %c0_131, %c56], %74 {strides = array<i32>} : memref<1x4x4x64xf32, #tpu.memory_space<vmem>>, vector<1x4x4x4xf32>,
    %c0_132 = arith.constant 0 : index
    %c3_133 = arith.constant 3 : index
    %c0_134 = arith.constant 0 : index
    %c3_135 = arith.constant 3 : index
    %c0_136 = arith.constant 0 : index
    %c0_137 = arith.constant 0 : index
    %75 = vector.load %arg2[%c0_132, %c3_133, %c0_134, %c3_135, %c0_136, %c0_137] : memref<1x4x4x4x4x4xf32, #tpu.memory_space<vmem>>, vector<1x1x4x1x4x4xf32>
    %76 = vector.shape_cast %75 : vector<1x1x4x1x4x4xf32> to vector<4x4x4xf32>
    %c0_138 = arith.constant 0 : index
    %c0_139 = arith.constant 0 : index
    %c0_140 = arith.constant 0 : index
    %c60 = arith.constant 60 : index
    %77 = vector.load %arg3[%c0_138, %c0_139, %c0_140, %c60] : memref<1x4x4x64xf32, #tpu.memory_space<vmem>>, vector<1x4x4x4xf32>
    %78 = vector.shape_cast %77 : vector<1x4x4x4xf32> to vector<4x4x4xf32>
    %79 = vector.shape_cast %76 : vector<4x4x4xf32> to vector<1x4x4x4xf32>
    tpu.vector_store %arg3[%c0_138, %c0_139, %c0_140, %c60], %79 {strides = array<i32>} : memref<1x4x4x64xf32, #tpu.memory_space<vmem>>, vector<1x4x4x4xf32>,
    return
  }
  func.func @transform_0(%arg0: i32, %arg1: i32) -> (i32, i32, i32, i32, i32, i32) {
    %c0_i32 = arith.constant 0 : i32
    %c0_i32_0 = arith.constant 0 : i32
    %c0_i32_1 = arith.constant 0 : i32
    %c0_i32_2 = arith.constant 0 : i32
    %c0_i32_3 = arith.constant 0 : i32
    return %arg0, %c0_i32, %arg1, %c0_i32_0, %c0_i32_1, %c0_i32_2 : i32, i32, i32, i32, i32, i32
  }
  func.func @transform_1(%arg0: i32, %arg1: i32) -> (i32, i32, i32, i32) {
    %c0_i32 = arith.constant 0 : i32
    %c0_i32_0 = arith.constant 0 : i32
    %c0_i32_1 = arith.constant 0 : i32
    return %arg0, %arg1, %c0_i32, %c0_i32_0 : i32, i32, i32, i32
  }
}

</mosaic_0001>

<bundles_post_ra>
// kernel: tpu_custom_call.1
= control target key start
LH: loop header
LB: loop body
LE: loop exit
PB: predicated region body
PF: predicated region fallthrough
CT: control target
= control target key end

     0   :  { %6 = vsyncpa [#allocation3], 0  ;;  %s1273_s0 = inlined_call_operand.hbm [shape: f32[2,4,4,4,4,4], index: 0, kind: input, shape index: {}]   ;;  %s1274_s1 = inlined_call_operand.hbm [shape: f32[2,4,4,64], index: 1, kind: output, shape index: {}]  }
   0x1   :  { %8 = vsyncpa [#allocation3 + $0x1], 0 }
   0x2   :  { %9 = vsyncpa [#allocation4], 0 }
   0x3   :  { %11 = vsyncpa [#allocation4 + $0x1], 0  ;;  %s959_s6 = smov 0   ;;  %s961_s7 = smov 0  }
   0x4   :  { %s963_s8 = smov 0   ;;  %s965_s9 = smov 0  }
   0x5   :  { %s967_s10 = smov 0   ;;  %s969_s11 = smov 0  }
   0x6 LB: > { %s658_s12 = sadd.s32 4294967295, %s927_s11   ;;  %s659_s13 = sadd.s32 4294967294, %s927_s11   ;;  %s927_s11 = sphi %s969_s11, %s17_s11   ;;  %s923_s10 = sphi %s967_s10, %s1289_s10   ;;  %s919_s9 = sphi %s965_s9, %s1288_s9   ;;  %s915_s8 = sphi %s963_s8, %s1287_s8   ;;  %s911_s7 = sphi %s961_s7, %s1286_s7   ;;  %s907_s6 = sphi %s959_s6, %s1285_s6  }
   0x7   : > { %s29_s14 = sadd.s32 1, %s923_s10  ;;  %s38_s15 = sadd.s32 1, %s915_s8 }
   0x8   : > { %p31_p0 = scmp.ge.s32.totalorder %s29_s14, 2  ;;  %p45_p1 = scmp.ne.s32.totalorder %s915_s8, %s911_s7 }
   0x9   : > { %p46_p2 = scmp.eq.s32.totalorder %s927_s11, 0  ;;  %p51_p3 = scmp.ne.s32.totalorder %s911_s7, %s907_s6 }
   0xa   : > { %s1291_s14 = smov (%p31_p0, %s29_s14), 0  ;;  %p52_p5 = scmp.eq.s32.totalorder %s658_s12, 0 }
   0xb   : > { %p1000_p4 = por %p46_p2, %p45_p1  ;;  %s33_s17 = ssub.s32 %s923_s10, %s1291_s14 }
   0xc   : > { %p77_p6 = scmp.eq.s32.totalorder %s658_s12, 1  ;;  %p36_p7 = scmp.eq.s32.totalorder %s33_s17, 0 }
   0xd   : > { %p1006_p8 = por %p52_p5, %p51_p3  ;;  %p83_p10 = scmp.eq.s32.totalorder %s659_s13, 1 }
   0xe   : > { %p1010_p9 = por %p77_p6, %p45_p1  ;;  %p747_p13 = scmp.lt.s32.totalorder %s927_s11, 2 }
   0xf   : > { %s1015_s20 = scalar_select %p36_p7, %s915_s8, %s38_s15  }
  0x10   : > { %s1278_s19 = scalar_select %p1010_p9, 1, 0 }
  0x11   : > { %p1017_p11 = por %p83_p10, %p51_p3  ;;  %s103_s22 = sand.u32 1, %s915_s8  }
  0x12   : > { %s662_s23 = sshll.u32 %s103_s22, 8  ;;  %s733_s24 = sshll.u32 %s923_s10, 12 }
  0x13   : > { %s1279_s21 = scalar_select %p1017_p11, 1, 0 }
  0x14   : > { %s1028_s27 = scalar_lea.hbm %s1273_s0, %s733_s24  ;;  %s107_s28 = scalar_lea.vmem [#allocation2], %s662_s23 }
  0x15   : > { %s117_s29 = sshll.u32 %s107_s28, 4  ;;  %p1034_p0 = pnand %p747_p13, %p1000_p4  ;;  %s1030_s29 = int_to_ptr.vmem [resolvable:$true] %s117_s29 }
  0x16   : > { %s1039_s2 = scalar_lea.sflag [#allocation3], %s103_s22  ;;  %s815_s3 = scalar_lea.hbm %s1028_s27, 4096 }
  0x17   : > { %p816_p2 = scmp.ne.s32.totalorder %s1028_s27, %s815_s3  ;;  %p817_p3 = pneg %p1034_p0 }
  0x18   : > { %s820_s12 = scalar_lea.hbm %s1273_s0, 8192  ;;  %p821_p4 = scmp.lt.u32.totalorder %s1028_s27, %s1273_s0 }
  0x19   : > { %p818_p5 = pnand %p817_p3, %p816_p2  ;;  %p822_p7 = scmp.lt.u32.totalorder %s820_s12, %s815_s3 }
  0x1a   : > { %p824_p13 = scmp.lt.u32.totalorder %s815_s3, %s1028_s27 }
  0x1b   : > { %p819_p6 = pneg %p818_p5  ;;  %p823_p10 = por %p822_p7, %p821_p4 }
  0x1d   : > { %p825_p12 = por %p824_p13, %p823_p10 }
  0x1f   : > { %p826_p1 = pnand %p825_p12, %p819_p6 }
  0x21   : > { %829 = shalt.err (!%p826_p1)
}
  0x22   : > { %s830_s16 = scalar_lea.vmem %s1030_s29, 4096  ;;  %s929_s17 = smov [#allocation2]  }
  0x23   : > { %p831_p2 = scmp.ne.s32.totalorder %s1030_s29, %s830_s16  ;;  %s835_s22 = sshll.u32 %s929_s17, 4  ;;  %s836_s22 = int_to_ptr.vmem [resolvable:$false] %s835_s22 }
  0x24   : > { %s837_s23 = scalar_lea.vmem %s836_s22, 8192  ;;  %p838_p9 = scmp.lt.s32.totalorder %s1030_s29, %s836_s22 }
  0x25   : > { %p833_p5 = pnand %p831_p2, %p817_p3  ;;  %p839_p4 = scmp.lt.s32.totalorder %s837_s23, %s830_s16 }
  0x27   : > { %p834_p11 = pneg %p833_p5  ;;  %p840_p7 = por %p839_p4, %p838_p9 }
  0x29   : > { %p841_p10 = pnand %p840_p7, %p834_p11 }
  0x2b   : > { %844 = shalt.err (!%p841_p10)
}
  0x2c   : > { %s930_s24 = smov 64   ;;  %s931_s25 = smov 4  }
  0x2d   : > { %742 = dma.hbm_to_vmem [thread:$0]  (!%p1034_p0), %s1028_s27, 4096, %s1030_s29, %s1039_s2, %s930_s24, %s930_s24, %s931_s25  }
  0x2e   : > { %p125_p12 = scmp.lt.s32.totalorder %s927_s11, 3  ;;  %p1281_p1 = scmp.ge.s32.totalorder %s927_s11, 1 }
  0x30   : > { %p126_p3 = pnand %p1281_p1, %p125_p12 }
  0x31   : > { %s1071_s26 = sand.u32 (!%p126_p3), 1, %s911_s7  }
  0x32   : > { %129 = sbr.rel (%p126_p3) target bundleno = 306 (0x132), region = 24  ;;  %s666_s28 = sshll.u32 (!%p126_p3), %s1071_s26, 8 }
  0x33   : > { %s132_s3 = scalar_lea.sflag (!%p126_p3), [#allocation3], %s1071_s26  ;;  %s1075_s4 = scalar_lea.vmem (!%p126_p3), [#allocation2], %s666_s28 }
  0x39   : > { %898 = dma.done.wait (%p1006_p8), %s132_s3, 4096  }
  0x3a   : > { %900 = vsyncadd (%p1006_p8), %s132_s3, 4294963200  ;;  %v670_v0 = vld [vmem:[%s1075_s4 + $0x24] sm:$0xf]  ;;  %s932_s27 = smov 4   ;;  %v671_v2 = vld [vmem:[%s1075_s4 + $0x34] sm:$0xf] }
  0x3b   : > { %v668_v1 = vld [vmem:[%s1075_s4 + $0x4] sm:$0xf]  ;;  %178 = vrot.lane.b32.xlu1 %v670_v0, %s932_s27  ;;  %v669_v3 = vld [vmem:[%s1075_s4 + $0x14] sm:$0xf]  ;;  %v673_v4 = vld [vmem:[%s1075_s4 + $0x18] sm:$0xf] }
  0x3c   : > { %174 = vrot.lane.b32.xlu0 %v668_v1, %s932_s27  ;;  %v672_v5 = vld [vmem:[%s1075_s4 + $0x8] sm:$0xf]  ;;  %s933_s18 = smov 8   ;;  %v675_v6 = vld [vmem:[%s1075_s4 + $0x38] sm:$0xf]  ;;  %s667_s29 = sshll.u32 %s1071_s26, 4 }
  0x3d   : > { %v674_v7 = vld [vmem:[%s1075_s4 + $0x28] sm:$0xf]  ;;  %v677_v8 = vld [vmem:[%s1075_s4 + $0x1c] sm:$0xf]  ;;  %v676_v9 = vld [vmem:[%s1075_s4 + $0xc] sm:$0xf] }
  0x3e   : > { %s934_s30 = smov 12   ;;  %v679_v10 = vld [vmem:[%s1075_s4 + $0x3c] sm:$0xf]  ;;  %v678_v11 = vld [vmem:[%s1075_s4 + $0x2c] sm:$0xf]  ;;  %vm160_vm0 = vcmask 27648  }
  0x3f   : > { %180 = vrot.lane.b32.xlu1 %v671_v2, %s932_s27  ;;  %v158_v12 = vld [vmem:[%s1075_s4 + $0x20] sm:$0xf]  ;;  %v681_v14 = vld [vmem:[%s1075_s4 + $0x50] sm:$0xf]  ;;  %s1102_s2 = scalar_lea.vmem [#allocation5], %s667_s29  ;;  %s935_s5 = smov 16  }
  0x40   : > { %176 = vrot.lane.b32.xlu0 %v669_v3, %s932_s27  ;;  %v156_v13 = vld [vmem:[%s1075_s4] sm:$0xf]  ;;  %163 = vst.msk [vmem:[%s1102_s2 + $0x8] sm:$0xf] %vm160_vm0, %v158_v12  ;;  %v159_v16 = vld [vmem:[%s1075_s4 + $0x30] sm:$0xf] }
  0x41   : > { %v680_v15 = vld [vmem:[%s1075_s4 + $0x40] sm:$0xf]  ;;  %161 = vst.msk [vmem:[%s1102_s2] sm:$0xf] %vm160_vm0, %v156_v13  ;;  %164 = vst.msk [vmem:[%s1102_s2 + $0xc] sm:$0xf] %vm160_vm0, %v159_v16 }
  0x42   : > { %v157_v17 = vld [vmem:[%s1075_s4 + $0x10] sm:$0xf]  ;;  %v682_v19 = vld [vmem:[%s1075_s4 + $0x60] sm:$0xf]  ;;  %v685_v20 = vld [vmem:[%s1075_s4 + $0x54] sm:$0xf] }
  0x43   : > { %202 = vrot.lane.b32.xlu1 %v673_v4, %s933_s18  ;;  %162 = vst.msk [vmem:[%s1102_s2 + $0x4] sm:$0xf] %vm160_vm0, %v157_v17  ;;  %v683_v18 = vld [vmem:[%s1075_s4 + $0x70] sm:$0xf]  ;;  %v684_v21 = vld [vmem:[%s1075_s4 + $0x44] sm:$0xf] }
  0x44   : > { %200 = vrot.lane.b32.xlu0 %v672_v5, %s933_s18  ;;  %s936_s12 = smov 20   ;;  %v687_v22 = vld [vmem:[%s1075_s4 + $0x74] sm:$0xf]  ;;  %v686_v23 = vld [vmem:[%s1075_s4 + $0x64] sm:$0xf]  ;;  %s937_s13 = smov 24  }
  0x45   : > { %v689_v24 = vld [vmem:[%s1075_s4 + $0x58] sm:$0xf]  ;;  %v688_v25 = vld [vmem:[%s1075_s4 + $0x48] sm:$0xf]  ;;  %v693_v28 = vld [vmem:[%s1075_s4 + $0x5c] sm:$0xf] }
  0x46   : > { %v691_v26 = vld [vmem:[%s1075_s4 + $0x78] sm:$0xf]  ;;  %v690_v27 = vld [vmem:[%s1075_s4 + $0x68] sm:$0xf]  ;;  %v692_v29 = vld [vmem:[%s1075_s4 + $0x4c] sm:$0xf] }
  0x47   : > { %206 = vrot.lane.b32.xlu1 %v675_v6, %s933_s18  ;;  %s938_s15 = smov 28   ;;  %v695_v30 = vld [vmem:[%s1075_s4 + $0x7c] sm:$0xf]  ;;  %v694_v31 = vld [vmem:[%s1075_s4 + $0x6c] sm:$0xf]  ;;  %s939_s16 = smov 32  }
  0x48   : > { %204 = vrot.lane.b32.xlu0 %v674_v7, %s933_s18  ;;  %v697_v32 = vld [vmem:[%s1075_s4 + $0x90] sm:$0xf]  ;;  %v696_v33 = vld [vmem:[%s1075_s4 + $0x80] sm:$0xf]  ;;  %v701_v36 = vld [vmem:[%s1075_s4 + $0x94] sm:$0xf] }
  0x49   : > { %v699_v34 = vld [vmem:[%s1075_s4 + $0xb0] sm:$0xf]  ;;  %v698_v35 = vld [vmem:[%s1075_s4 + $0xa0] sm:$0xf]  ;;  %v700_v37 = vld [vmem:[%s1075_s4 + $0x84] sm:$0xf] }
  0x4a   : > { %s940_s17 = smov 36   ;;  %v703_v38 = vld [vmem:[%s1075_s4 + $0xb4] sm:$0xf]  ;;  %v702_v39 = vld [vmem:[%s1075_s4 + $0xa4] sm:$0xf]  ;;  %s941_s22 = smov 40  }
  0x4b   : > { %228 = vrot.lane.b32.xlu1 %v677_v8, %s934_s30  ;;  %v705_v40 = vld [vmem:[%s1075_s4 + $0x98] sm:$0xf]  ;;  %v704_v41 = vld [vmem:[%s1075_s4 + $0x88] sm:$0xf]  ;;  %v709_v44 = vld [vmem:[%s1075_s4 + $0x9c] sm:$0xf] }
  0x4c   : > { %226 = vrot.lane.b32.xlu0 %v676_v9, %s934_s30  ;;  %v707_v42 = vld [vmem:[%s1075_s4 + $0xb8] sm:$0xf]  ;;  %v706_v43 = vld [vmem:[%s1075_s4 + $0xa8] sm:$0xf]  ;;  %v708_v45 = vld [vmem:[%s1075_s4 + $0x8c] sm:$0xf] }
  0x4d   : > { %s942_s23 = smov 44   ;;  %v711_v46 = vld [vmem:[%s1075_s4 + $0xbc] sm:$0xf]  ;;  %v710_v47 = vld [vmem:[%s1075_s4 + $0xac] sm:$0xf]  ;;  %s943_s24 = smov 48  }
  0x4e   : > { %v713_v48 = vld [vmem:[%s1075_s4 + $0xd0] sm:$0xf]  ;;  %v712_v49 = vld [vmem:[%s1075_s4 + $0xc0] sm:$0xf]  ;;  %v717_v52 = vld [vmem:[%s1075_s4 + $0xd4] sm:$0xf] }
  0x4f   : > { %232 = vrot.lane.b32.xlu1 %v679_v10, %s934_s30  ;;  %v715_v50 = vld [vmem:[%s1075_s4 + $0xf0] sm:$0xf]  ;;  %v714_v51 = vld [vmem:[%s1075_s4 + $0xe0] sm:$0xf]  ;;  %v716_v53 = vld [vmem:[%s1075_s4 + $0xc4] sm:$0xf] }
  0x50   : > { %230 = vrot.lane.b32.xlu0 %v678_v11, %s934_s30  ;;  %s944_s25 = smov 52   ;;  %v719_v54 = vld [vmem:[%s1075_s4 + $0xf4] sm:$0xf]  ;;  %v718_v55 = vld [vmem:[%s1075_s4 + $0xe4] sm:$0xf]  ;;  %s945_s28 = smov 56  }
  0x51   : > { %v721_v56 = vld [vmem:[%s1075_s4 + $0xd8] sm:$0xf]  ;;  %v720_v57 = vld [vmem:[%s1075_s4 + $0xc8] sm:$0xf]  ;;  %v725_v60 = vld [vmem:[%s1075_s4 + $0xdc] sm:$0xf] }
  0x52   : > { %v723_v58 = vld [vmem:[%s1075_s4 + $0xf8] sm:$0xf]  ;;  %v722_v59 = vld [vmem:[%s1075_s4 + $0xe8] sm:$0xf]  ;;  %v724_v61 = vld [vmem:[%s1075_s4 + $0xcc] sm:$0xf] }
  0x53   : > { %254 = vrot.lane.b32.xlu1 %v681_v14, %s935_s5  ;;  %s946_s3 = smov 60   ;;  %vm186_vm1 = vcmask 60448   ;;  %v727_v62 = vld [vmem:[%s1075_s4 + $0xfc] sm:$0xf]  ;;  %v726_v63 = vld [vmem:[%s1075_s4 + $0xec] sm:$0xf] }
  0x54   : > { %252 = vrot.lane.b32.xlu0 %v680_v15, %s935_s5  ;;  %vm212_vm2 = vcmask 93248   ;;  %vm238_vm3 = vcmask 126048   ;;  %vm264_vm4 = vcmask 158848   ;;  %vm290_vm5 = vcmask 191648   ;;  %s734_s4 = sshll.u32 %s919_s9, 8  ;;  %s571_s18 = sshll.u32 %s1102_s2, 4  ;;  %s1221_s18 = int_to_ptr.vmem [resolvable:$true] %s571_s18 }
  0x55   : > { %vm316_vm6 = vcmask 224448   ;;  %vm342_vm7 = vcmask 257248   ;;  %vm368_vm8 = vcmask 290048   ;;  %vm394_vm9 = vcmask 322848   ;;  %s556_s9 = scalar_lea.sflag [#allocation4], %s1071_s26  ;;  %p1282_p9 = scmp.ne.s32.totalorder %s1278_s19, 0 }
  0x56   : > { %vm420_vm10 = vcmask 355648   ;;  %vm446_vm11 = vcmask 388448   ;;  %vm472_vm12 = vcmask 421248   ;;  %vm498_vm13 = vcmask 454048  }
  0x57   : > { %258 = vrot.lane.b32.xlu1 %v683_v18, %s935_s5  ;;  %vm524_vm14 = vcmask 486848   ;;  %vm550_vm15 = vcmask 519648  }
  0x58   : > { %256 = vrot.lane.b32.xlu0 %v682_v19, %s935_s5  ;;  %s1219_s5 = scalar_lea.hbm %s1274_s1, %s734_s4 }
  0x5b   : > { %280 = vrot.lane.b32.xlu1 %v685_v20, %s936_s12 }
  0x5c   : > { %278 = vrot.lane.b32.xlu0 %v684_v21, %s936_s12 }
  0x5f   : > { %284 = vrot.lane.b32.xlu1 %v687_v22, %s936_s12 }
  0x60   : > { %282 = vrot.lane.b32.xlu0 %v686_v23, %s936_s12  ;;  %s845_s12 = scalar_lea.vmem %s1221_s18, 256 }
  0x61   : > { %p846_p8 = scmp.ne.s32.totalorder %s1221_s18, %s845_s12 }
  0x63   : > { %306 = vrot.lane.b32.xlu1 %v689_v24, %s937_s13  ;;  %p847_p11 = pnand %p846_p8, %p1282_p9 }
  0x64   : > { %304 = vrot.lane.b32.xlu0 %v688_v25, %s937_s13 }
  0x65   : > { %p848_p0 = pneg %p847_p11 }
  0x67   : > { %310 = vrot.lane.b32.xlu1 %v691_v26, %s937_s13 }
  0x68   : > { %308 = vrot.lane.b32.xlu0 %v690_v27, %s937_s13  ;;  %s947_s13 = smov [#allocation5]  }
  0x6b   : > { %332 = vrot.lane.b32.xlu1 %v693_v28, %s938_s15 }
  0x6c   : > { %330 = vrot.lane.b32.xlu0 %v692_v29, %s938_s15 }
  0x6f   : > { %336 = vrot.lane.b32.xlu1 %v695_v30, %s938_s15 }
  0x70   : > { %334 = vrot.lane.b32.xlu0 %v694_v31, %s938_s15  ;;  %s849_s15 = sshll.u32 %s947_s13, 4  ;;  %s850_s15 = int_to_ptr.vmem [resolvable:$false] %s849_s15 }
  0x71   : > { %p852_p6 = scmp.lt.s32.totalorder %s1221_s18, %s850_s15 }
  0x73   : > { %358 = vrot.lane.b32.xlu1 %v697_v32, %s939_s16 }
  0x74   : > { %356 = vrot.lane.b32.xlu0 %v696_v33, %s939_s16 }
  0x77   : > { %362 = vrot.lane.b32.xlu1 %v699_v34, %s939_s16 }
  0x78   : > { %360 = vrot.lane.b32.xlu0 %v698_v35, %s939_s16  ;;  %s851_s16 = scalar_lea.vmem %s850_s15, 512 }
  0x79   : > { %p853_p13 = scmp.lt.s32.totalorder %s851_s16, %s845_s12 }
  0x7b   : > { %384 = vrot.lane.b32.xlu1 %v701_v36, %s940_s17  ;;  %p854_p2 = por %p853_p13, %p852_p6 }
  0x7c   : > { %382 = vrot.lane.b32.xlu0 %v700_v37, %s940_s17 }
  0x7d   : > { %p855_p5 = pnand %p854_p2, %p848_p0 }
  0x7f   : > { %388 = vrot.lane.b32.xlu1 %v703_v38, %s940_s17 }
  0x80   : > { %386 = vrot.lane.b32.xlu0 %v702_v39, %s940_s17 }
  0x83   : > { %410 = vrot.lane.b32.xlu1 %v705_v40, %s941_s22 }
  0x84   : > { %408 = vrot.lane.b32.xlu0 %v704_v41, %s941_s22 }
  0x87   : > { %414 = vrot.lane.b32.xlu1 %v707_v42, %s941_s22 }
  0x88   : > { %412 = vrot.lane.b32.xlu0 %v706_v43, %s941_s22 }
  0x8b   : > { %436 = vrot.lane.b32.xlu1 %v709_v44, %s942_s23 }
  0x8c   : > { %434 = vrot.lane.b32.xlu0 %v708_v45, %s942_s23 }
  0x8f   : > { %440 = vrot.lane.b32.xlu1 %v711_v46, %s942_s23 }
  0x90   : > { %438 = vrot.lane.b32.xlu0 %v710_v47, %s942_s23 }
  0x93   : > { %462 = vrot.lane.b32.xlu1 %v713_v48, %s943_s24 }
  0x94   : > { %460 = vrot.lane.b32.xlu0 %v712_v49, %s943_s24 }
  0x97   : > { %466 = vrot.lane.b32.xlu1 %v715_v50, %s943_s24 }
  0x98   : > { %464 = vrot.lane.b32.xlu0 %v714_v51, %s943_s24 }
  0x9b   : > { %488 = vrot.lane.b32.xlu1 %v717_v52, %s944_s25 }
  0x9c   : > { %486 = vrot.lane.b32.xlu0 %v716_v53, %s944_s25 }
  0x9f   : > { %492 = vrot.lane.b32.xlu1 %v719_v54, %s944_s25 }
  0xa0   : > { %490 = vrot.lane.b32.xlu0 %v718_v55, %s944_s25 }
  0xa3   : > { %514 = vrot.lane.b32.xlu1 %v721_v56, %s945_s28 }
  0xa4   : > { %512 = vrot.lane.b32.xlu0 %v720_v57, %s945_s28 }
  0xa7   : > { %518 = vrot.lane.b32.xlu1 %v723_v58, %s945_s28 }
  0xa8   : > { %516 = vrot.lane.b32.xlu0 %v722_v59, %s945_s28 }
  0xab   : > { %540 = vrot.lane.b32.xlu1 %v725_v60, %s946_s3 }
  0xac   : > { %538 = vrot.lane.b32.xlu0 %v724_v61, %s946_s3 }
  0xad   : > { %v179_v0 = vpop.permute.xlu1 %178 }
  0xae   : > { %v175_v1 = vpop.permute.xlu0 %174  ;;  %189 = vst.msk [vmem:[%s1102_s2 + $0x8] sm:$0xf] %vm186_vm1, %v179_v0 }
  0xaf   : > { %187 = vst.msk [vmem:[%s1102_s2] sm:$0xf] %vm186_vm1, %v175_v1  ;;  %544 = vrot.lane.b32.xlu1 %v727_v62, %s946_s3 }
  0xb0   : > { %542 = vrot.lane.b32.xlu0 %v726_v63, %s946_s3 }
  0xb1   : > { %v181_v2 = vpop.permute.xlu1 %180 }
  0xb2   : > { %v177_v3 = vpop.permute.xlu0 %176  ;;  %190 = vst.msk [vmem:[%s1102_s2 + $0xc] sm:$0xf] %vm186_vm1, %v181_v2 }
  0xb3   : > { %188 = vst.msk [vmem:[%s1102_s2 + $0x4] sm:$0xf] %vm186_vm1, %v177_v3 }
  0xb5   : > { %v203_v4 = vpop.permute.xlu1 %202 }
  0xb6   : > { %v201_v5 = vpop.permute.xlu0 %200  ;;  %214 = vst.msk [vmem:[%s1102_s2 + $0x4] sm:$0xf] %vm212_vm2, %v203_v4 }
  0xb7   : > { %213 = vst.msk [vmem:[%s1102_s2] sm:$0xf] %vm212_vm2, %v201_v5 }
  0xb9   : > { %v207_v6 = vpop.permute.xlu1 %206 }
  0xba   : > { %v205_v7 = vpop.permute.xlu0 %204  ;;  %216 = vst.msk [vmem:[%s1102_s2 + $0xc] sm:$0xf] %vm212_vm2, %v207_v6 }
  0xbb   : > { %215 = vst.msk [vmem:[%s1102_s2 + $0x8] sm:$0xf] %vm212_vm2, %v205_v7 }
  0xbd   : > { %v229_v8 = vpop.permute.xlu1 %228 }
  0xbe   : > { %v227_v9 = vpop.permute.xlu0 %226  ;;  %240 = vst.msk [vmem:[%s1102_s2 + $0x4] sm:$0xf] %vm238_vm3, %v229_v8 }
  0xbf   : > { %239 = vst.msk [vmem:[%s1102_s2] sm:$0xf] %vm238_vm3, %v227_v9 }
  0xc1   : > { %v233_v10 = vpop.permute.xlu1 %232 }
  0xc2   : > { %v231_v11 = vpop.permute.xlu0 %230  ;;  %242 = vst.msk [vmem:[%s1102_s2 + $0xc] sm:$0xf] %vm238_vm3, %v233_v10 }
  0xc3   : > { %241 = vst.msk [vmem:[%s1102_s2 + $0x8] sm:$0xf] %vm238_vm3, %v231_v11 }
  0xc5   : > { %v255_v12 = vpop.permute.xlu1 %254 }
  0xc6   : > { %v253_v13 = vpop.permute.xlu0 %252  ;;  %266 = vst.msk [vmem:[%s1102_s2 + $0x4] sm:$0xf] %vm264_vm4, %v255_v12 }
  0xc7   : > { %265 = vst.msk [vmem:[%s1102_s2] sm:$0xf] %vm264_vm4, %v253_v13 }
  0xc9   : > { %v259_v14 = vpop.permute.xlu1 %258 }
  0xca   : > { %v257_v15 = vpop.permute.xlu0 %256  ;;  %268 = vst.msk [vmem:[%s1102_s2 + $0xc] sm:$0xf] %vm264_vm4, %v259_v14 }
  0xcb   : > { %267 = vst.msk [vmem:[%s1102_s2 + $0x8] sm:$0xf] %vm264_vm4, %v257_v15 }
  0xcd   : > { %v281_v16 = vpop.permute.xlu1 %280 }
  0xce   : > { %v279_v17 = vpop.permute.xlu0 %278  ;;  %292 = vst.msk [vmem:[%s1102_s2 + $0x4] sm:$0xf] %vm290_vm5, %v281_v16 }
  0xcf   : > { %291 = vst.msk [vmem:[%s1102_s2] sm:$0xf] %vm290_vm5, %v279_v17 }
  0xd1   : > { %v285_v18 = vpop.permute.xlu1 %284 }
  0xd2   : > { %v283_v19 = vpop.permute.xlu0 %282  ;;  %294 = vst.msk [vmem:[%s1102_s2 + $0xc] sm:$0xf] %vm290_vm5, %v285_v18 }
  0xd3   : > { %293 = vst.msk [vmem:[%s1102_s2 + $0x8] sm:$0xf] %vm290_vm5, %v283_v19 }
  0xd5   : > { %v307_v20 = vpop.permute.xlu1 %306 }
  0xd6   : > { %v305_v21 = vpop.permute.xlu0 %304  ;;  %318 = vst.msk [vmem:[%s1102_s2 + $0x4] sm:$0xf] %vm316_vm6, %v307_v20 }
  0xd7   : > { %317 = vst.msk [vmem:[%s1102_s2] sm:$0xf] %vm316_vm6, %v305_v21 }
  0xd9   : > { %v311_v22 = vpop.permute.xlu1 %310 }
  0xda   : > { %v309_v23 = vpop.permute.xlu0 %308  ;;  %320 = vst.msk [vmem:[%s1102_s2 + $0xc] sm:$0xf] %vm316_vm6, %v311_v22 }
  0xdb   : > { %319 = vst.msk [vmem:[%s1102_s2 + $0x8] sm:$0xf] %vm316_vm6, %v309_v23 }
  0xdd   : > { %v333_v24 = vpop.permute.xlu1 %332 }
  0xde   : > { %v331_v25 = vpop.permute.xlu0 %330  ;;  %344 = vst.msk [vmem:[%s1102_s2 + $0x4] sm:$0xf] %vm342_vm7, %v333_v24 }
  0xdf   : > { %343 = vst.msk [vmem:[%s1102_s2] sm:$0xf] %vm342_vm7, %v331_v25 }
  0xe1   : > { %v337_v26 = vpop.permute.xlu1 %336 }
  0xe2   : > { %v335_v27 = vpop.permute.xlu0 %334  ;;  %346 = vst.msk [vmem:[%s1102_s2 + $0xc] sm:$0xf] %vm342_vm7, %v337_v26 }
  0xe3   : > { %345 = vst.msk [vmem:[%s1102_s2 + $0x8] sm:$0xf] %vm342_vm7, %v335_v27 }
  0xe5   : > { %v359_v28 = vpop.permute.xlu1 %358 }
  0xe6   : > { %v357_v29 = vpop.permute.xlu0 %356  ;;  %370 = vst.msk [vmem:[%s1102_s2 + $0x4] sm:$0xf] %vm368_vm8, %v359_v28 }
  0xe7   : > { %369 = vst.msk [vmem:[%s1102_s2] sm:$0xf] %vm368_vm8, %v357_v29 }
  0xe9   : > { %v363_v30 = vpop.permute.xlu1 %362 }
  0xea   : > { %v361_v31 = vpop.permute.xlu0 %360  ;;  %372 = vst.msk [vmem:[%s1102_s2 + $0xc] sm:$0xf] %vm368_vm8, %v363_v30 }
  0xeb   : > { %371 = vst.msk [vmem:[%s1102_s2 + $0x8] sm:$0xf] %vm368_vm8, %v361_v31 }
  0xed   : > { %v385_v32 = vpop.permute.xlu1 %384 }
  0xee   : > { %v383_v33 = vpop.permute.xlu0 %382  ;;  %396 = vst.msk [vmem:[%s1102_s2 + $0x4] sm:$0xf] %vm394_vm9, %v385_v32 }
  0xef   : > { %395 = vst.msk [vmem:[%s1102_s2] sm:$0xf] %vm394_vm9, %v383_v33 }
  0xf1   : > { %v389_v34 = vpop.permute.xlu1 %388 }
  0xf2   : > { %v387_v35 = vpop.permute.xlu0 %386  ;;  %398 = vst.msk [vmem:[%s1102_s2 + $0xc] sm:$0xf] %vm394_vm9, %v389_v34 }
  0xf3   : > { %397 = vst.msk [vmem:[%s1102_s2 + $0x8] sm:$0xf] %vm394_vm9, %v387_v35 }
  0xf5   : > { %v411_v36 = vpop.permute.xlu1 %410 }
  0xf6   : > { %v409_v37 = vpop.permute.xlu0 %408  ;;  %422 = vst.msk [vmem:[%s1102_s2 + $0x4] sm:$0xf] %vm420_vm10, %v411_v36 }
  0xf7   : > { %421 = vst.msk [vmem:[%s1102_s2] sm:$0xf] %vm420_vm10, %v409_v37 }
  0xf9   : > { %v415_v38 = vpop.permute.xlu1 %414 }
  0xfa   : > { %v413_v39 = vpop.permute.xlu0 %412  ;;  %424 = vst.msk [vmem:[%s1102_s2 + $0xc] sm:$0xf] %vm420_vm10, %v415_v38 }
  0xfb   : > { %423 = vst.msk [vmem:[%s1102_s2 + $0x8] sm:$0xf] %vm420_vm10, %v413_v39 }
  0xfd   : > { %v437_v40 = vpop.permute.xlu1 %436 }
  0xfe   : > { %v435_v41 = vpop.permute.xlu0 %434  ;;  %448 = vst.msk [vmem:[%s1102_s2 + $0x4] sm:$0xf] %vm446_vm11, %v437_v40 }
  0xff   : > { %447 = vst.msk [vmem:[%s1102_s2] sm:$0xf] %vm446_vm11, %v435_v41 }
 0x101   : > { %v441_v42 = vpop.permute.xlu1 %440 }
 0x102   : > { %v439_v43 = vpop.permute.xlu0 %438  ;;  %450 = vst.msk [vmem:[%s1102_s2 + $0xc] sm:$0xf] %vm446_vm11, %v441_v42 }
 0x103   : > { %449 = vst.msk [vmem:[%s1102_s2 + $0x8] sm:$0xf] %vm446_vm11, %v439_v43 }
 0x105   : > { %v463_v44 = vpop.permute.xlu1 %462 }
 0x106   : > { %v461_v45 = vpop.permute.xlu0 %460  ;;  %474 = vst.msk [vmem:[%s1102_s2 + $0x4] sm:$0xf] %vm472_vm12, %v463_v44 }
 0x107   : > { %473 = vst.msk [vmem:[%s1102_s2] sm:$0xf] %vm472_vm12, %v461_v45 }
 0x109   : > { %v467_v46 = vpop.permute.xlu1 %466 }
 0x10a   : > { %v465_v47 = vpop.permute.xlu0 %464  ;;  %476 = vst.msk [vmem:[%s1102_s2 + $0xc] sm:$0xf] %vm472_vm12, %v467_v46 }
 0x10b   : > { %475 = vst.msk [vmem:[%s1102_s2 + $0x8] sm:$0xf] %vm472_vm12, %v465_v47 }
 0x10d   : > { %v489_v48 = vpop.permute.xlu1 %488 }
 0x10e   : > { %v487_v49 = vpop.permute.xlu0 %486  ;;  %500 = vst.msk [vmem:[%s1102_s2 + $0x4] sm:$0xf] %vm498_vm13, %v489_v48 }
 0x10f   : > { %499 = vst.msk [vmem:[%s1102_s2] sm:$0xf] %vm498_vm13, %v487_v49 }
 0x111   : > { %v493_v50 = vpop.permute.xlu1 %492 }
 0x112   : > { %v491_v51 = vpop.permute.xlu0 %490  ;;  %502 = vst.msk [vmem:[%s1102_s2 + $0xc] sm:$0xf] %vm498_vm13, %v493_v50 }
 0x113   : > { %501 = vst.msk [vmem:[%s1102_s2 + $0x8] sm:$0xf] %vm498_vm13, %v491_v51 }
 0x115   : > { %v515_v52 = vpop.permute.xlu1 %514 }
 0x116   : > { %v513_v53 = vpop.permute.xlu0 %512  ;;  %526 = vst.msk [vmem:[%s1102_s2 + $0x4] sm:$0xf] %vm524_vm14, %v515_v52 }
 0x117   : > { %525 = vst.msk [vmem:[%s1102_s2] sm:$0xf] %vm524_vm14, %v513_v53 }
 0x119   : > { %v519_v54 = vpop.permute.xlu1 %518 }
 0x11a   : > { %v517_v55 = vpop.permute.xlu0 %516  ;;  %528 = vst.msk [vmem:[%s1102_s2 + $0xc] sm:$0xf] %vm524_vm14, %v519_v54 }
 0x11b   : > { %527 = vst.msk [vmem:[%s1102_s2 + $0x8] sm:$0xf] %vm524_vm14, %v517_v55 }
 0x11d   : > { %v541_v56 = vpop.permute.xlu1 %540 }
 0x11e   : > { %v539_v57 = vpop.permute.xlu0 %538  ;;  %552 = vst.msk [vmem:[%s1102_s2 + $0x4] sm:$0xf] %vm550_vm15, %v541_v56 }
 0x11f   : > { %551 = vst.msk [vmem:[%s1102_s2] sm:$0xf] %vm550_vm15, %v539_v57 }
 0x121   : > { %v545_v58 = vpop.permute.xlu1 %544 }
 0x122   : > { %v543_v59 = vpop.permute.xlu0 %542  ;;  %554 = vst.msk [vmem:[%s1102_s2 + $0xc] sm:$0xf] %vm550_vm15, %v545_v58 }
 0x123   : > { %553 = vst.msk [vmem:[%s1102_s2 + $0x8] sm:$0xf] %vm550_vm15, %v543_v59 }
 0x124   : > { %858 = shalt.err (!%p855_p5)
}
 0x125   : > { %s859_s2 = scalar_lea.hbm %s1219_s5, 256  ;;  %s863_s23 = scalar_lea.hbm %s1274_s1, 512 }
 0x126   : > { %p860_p4 = scmp.ne.s32.totalorder %s1219_s5, %s859_s2  ;;  %p864_p12 = scmp.lt.u32.totalorder %s1219_s5, %s1274_s1 }
 0x127   : > { %p865_p1 = scmp.lt.u32.totalorder %s863_s23, %s859_s2  ;;  %p867_p8 = scmp.lt.u32.totalorder %s859_s2, %s1219_s5 }
 0x128   : > { %p861_p7 = pnand %p860_p4, %p1282_p9 }
 0x129   : > { %p866_p3 = por %p865_p1, %p864_p12 }
 0x12a   : > { %p862_p10 = pneg %p861_p7 }
 0x12b   : > { %p868_p11 = por %p867_p8, %p866_p3 }
 0x12d   : > { %p869_p0 = pnand %p868_p11, %p862_p10 }
 0x12f   : > { %872 = shalt.err (!%p869_p0)
}
 0x130   : > { %s948_s28 = smov 64  }
 0x131   : > { %737 = dma.vmem_to_hbm [thread:$0]  (%p1282_p9), %s1221_s18, 256, %s1219_s5, %s556_s9, %s948_s28, %s948_s28, %s932_s27  }
 0x132 PF: > { %s586_s3 = sand.u32 1, %s907_s6   ;;  %p1283_p6 = scmp.ne.s32.totalorder %s1279_s21, 0 }
 0x133   : > { %p1284_p13 = scmp.ge.s32.totalorder %s927_s11, 2  ;;  %s587_s4 = scalar_lea.sflag [#allocation4], %s586_s3 }
 0x135   : > { %p744_p2 = pnand %p1284_p13, %p1283_p6 }
 0x137   : > { %902 = dma.done.wait (!%p744_p2), %s587_s4, 256  }
 0x138   : > { %904 = vsyncadd (!%p744_p2), %s587_s4, 4294967040  ;;  %s17_s11 = sadd.s32 1, %s927_s11   ;;  %s1285_s6 = smov %s911_s7 }
 0x139   : > { %p14_p5 = scmp.ge.s32.totalorder %s17_s11, 4   ;;  %s1286_s7 = smov %s915_s8 }
 0x13a   : > { %s1287_s8 = smov %s1015_s20  ;;  %s1288_s9 = smov %s923_s10 }
 0x13b   : > { %s1289_s10 = smov %s1291_s14  ;;  %16 = sbr.rel (!%p14_p5) target bundleno = 6 (0x6), region = 84 }
 0x142   :  { %592 = vsyncpa [#allocation3], 1 }
 0x143   :  { %594 = vsyncpa [#allocation3 + $0x1], 1 }
 0x144   :  { %595 = vsyncpa [#allocation4], 1 }
 0x145   :  { %597 = vsyncpa [#allocation4 + $0x1], 1 }

</bundles_post_ra>
